<compile_context>
chip_gen: v6e
topology: v6e:2x2x1
jax: 0.10.0
libtpu: 0.0.40
codegen_flags: <defaults>
</compile_context>

<pallas_src>
import math

import jax
import jax.numpy as jnp
from jax import lax
from jax.experimental import pallas as pl
from jax.experimental.pallas import tpu as pltpu

EPS = 1e-5


def _round_up(x, m):
    return ((x + m - 1) // m) * m


def _bn_affine(gamma, beta, running_mean, running_var):
    scale = gamma / jnp.sqrt(running_var + EPS)
    shift = beta - running_mean * scale
    return scale, shift


def _make_kernel(n_cat, k_pad, bias_row):
    def kernel(cat_ref, num_ref, w1c_ref, w1n_ref, w2_ref, b2_ref,
               w3_ref, b3_ref, out_ref):
        tb = out_ref.shape[1]
        cat = cat_ref[...]                                  # (n_cat, TB) int32, global ids

        # Combined one-hot feature block, batch along lanes: (k_pad, TB).
        # Row `bias_row` is a constant 1 so the matching weight row adds b1f.
        row_ids = lax.broadcasted_iota(jnp.int32, (k_pad, tb), 0)
        feat = (row_ids == bias_row).astype(jnp.float32)
        for j in range(n_cat):
            feat = feat + (cat[j:j + 1, :] == row_ids).astype(jnp.float32)

        # Layer 1: one merged K=k_pad matmul (all embedding tables + bias folded)
        # plus the small numerical matmul (BN1 folded into w1n).
        h = jnp.dot(w1c_ref[...], feat, preferred_element_type=jnp.float32)
        h = h + jnp.dot(w1n_ref[...], num_ref[...].astype(jnp.float32),
                        preferred_element_type=jnp.float32)
        h = jnp.maximum(h, 0.0)                             # relu; BN2 folded into w2

        h = jnp.dot(w2_ref[...], h, preferred_element_type=jnp.float32) + b2_ref[...]
        h = jnp.maximum(h, 0.0)                             # relu; BN3 folded into w3

        out_ref[...] = (jnp.dot(w3_ref[...], h, preferred_element_type=jnp.float32)
                        + b3_ref[...])                      # (1, TB) lane-dense store
    return kernel


def _fold_params(params, k_pad):
    """Fold eval-mode BatchNorms + embedding tables into (transposed) weights."""
    emb_tables = params["emb_tables"]
    w1, b1 = params["w1"], params["b1"]
    w2, b2 = params["w2"], params["b2"]
    w3, b3 = params["w3"], params["b3"]

    s1, t1 = _bn_affine(*params["bn1"])          # over numerical columns (pre-linear_1)
    s2, t2 = _bn_affine(*params["bn2"])          # over 64 (pre-linear_2)
    s3, t3 = _bn_affine(*params["bn3"])          # over 16 (pre-linear_3)

    emb_dims = [t.shape[1] for t in emb_tables]
    emb_total = sum(emb_dims)
    total_cards = sum(t.shape[0] for t in emb_tables)

    # Rows of the merged first-layer weight: per-category folded rows, then bias row.
    rows = []
    off = 0
    for t in emb_tables:
        d = t.shape[1]
        rows.append(t @ w1[off:off + d, :])      # (card_i, 64)
        off += d
    w1_num = w1[emb_total:, :]                   # (numerical_size, 64)
    b1f = b1 + t1 @ w1_num                       # bias + BN1 shift contribution
    rows.append(b1f.reshape(1, -1))              # row index == total_cards
    w1comb = jnp.concatenate(rows, axis=0)       # (total_cards + 1, 64)
    if k_pad > total_cards + 1:
        w1comb = jnp.concatenate(
            [w1comb, jnp.zeros((k_pad - total_cards - 1, 64), jnp.float32)], axis=0)

    w1ct = w1comb.T                              # (64, k_pad)
    w1nt = (s1[:, None] * w1_num).T              # (64, numerical_size)

    w2f = s2[:, None] * w2
    b2f = b2 + t2 @ w2
    w3f = s3[:, None] * w3
    b3f = b3 + t3 @ w3

    return w1ct, w1nt, w2f.T, b2f.reshape(-1, 1), w3f.T, b3f.reshape(-1, 1)


def zero_classifier_forward(params, numerical, categorical, *,
                            block_b=8192, num_dtype=jnp.bfloat16):
    """Eval-mode forward of ZeroClassifier.
    numerical: (B, numerical_size) f32, categorical: (B, n_cat) int."""
    numerical = numerical.astype(jnp.float32)
    categorical = categorical.astype(jnp.int32)

    B, num_size = numerical.shape
    n_cat = categorical.shape[1]
    cards = [int(t.shape[0]) for t in params["emb_tables"]]
    total_cards = sum(cards)
    k_pad = _round_up(total_cards + 1, 8)        # +1 bias row; sublane-aligned
    bias_row = total_cards

    w1ct, w1nt, w2t, b2c, w3t, b3c = _fold_params(params, k_pad)

    # Pre-offset categorical ids into one global id space; batch goes on lanes.
    offs, acc = [], 0
    for c in cards:
        offs.append(acc)
        acc += c
    cat_g = (categorical + jnp.asarray(offs, jnp.int32)[None, :]).T   # (n_cat, B)
    num_t = numerical.T.astype(num_dtype)                             # (num_size, B)

    # Batch tile (lane dim, multiple of 128): large to amortize per-step overhead,
    # >=2 tiles when the batch permits (v7x has 2 TensorCores), capped so the f32
    # intermediates (feat + h1 + h2) stay within ~6 MiB of VMEM.
    b_lane = _round_up(B, 128)
    tb = min(block_b, b_lane)
    if b_lane >= 256:
        tb = min(tb, _round_up((b_lane + 1) // 2, 128))
    vmem_cap = max(128, (((6 << 20) // (4 * (k_pad + 64 + 16))) // 128) * 128)
    tb = max(128, _round_up(min(tb, vmem_cap), 128))
    bp = _round_up(B, tb)

    pad = bp - B
    if pad:
        cat_g = jnp.pad(cat_g, ((0, 0), (0, pad)))
        num_t = jnp.pad(num_t, ((0, 0), (0, pad)))

    weight_args = (w1ct, w1nt, w2t, b2c, w3t, b3c)
    stream_specs = [
        pl.BlockSpec((n_cat, tb), lambda i: (0, i)),        # categorical ids per tile
        pl.BlockSpec((num_size, tb), lambda i: (0, i)),     # numerical (bf16) per tile
    ]
    weight_specs = [pl.BlockSpec(w.shape, lambda i: (0, 0))  # VMEM-resident weights
                    for w in weight_args]

    flops = 2 * bp * (k_pad * 64 + num_size * 64 + 64 * 16 + 16)
    bytes_accessed = int(bp * (n_cat * 4 + num_size * jnp.dtype(num_dtype).itemsize + 4)
                         + sum(int(w.size) for w in weight_args) * 4)

    out = pl.pallas_call(
        _make_kernel(n_cat, k_pad, bias_row),
        out_shape=jax.ShapeDtypeStruct((1, bp), jnp.float32),
        grid=(bp // tb,),
        in_specs=stream_specs + weight_specs,
        out_specs=pl.BlockSpec((1, tb), lambda i: (0, i)),
        compiler_params=pltpu.CompilerParams(
            dimension_semantics=("parallel",),
            vmem_limit_bytes=32 * 1024 * 1024),
        cost_estimate=pl.CostEstimate(
            flops=flops, transcendentals=0, bytes_accessed=bytes_accessed),
    )(cat_g, num_t, *weight_args)

    return out[0, :B].reshape(B, 1)


# ---------------------------------------------------------------------------
# Deterministic parameter construction (mirrors the shapes in __init__).
# ---------------------------------------------------------------------------
def _linear_init(key, fan_in, fan_out):
    # PyTorch nn.Linear default: U(-1/sqrt(fan_in), 1/sqrt(fan_in)).
    kw, kb = jax.random.split(key)
    bound = 1.0 / math.sqrt(fan_in)
    w = jax.random.uniform(kw, (fan_in, fan_out), jnp.float32, -bound, bound)
    b = jax.random.uniform(kb, (fan_out,), jnp.float32, -bound, bound)
    return w, b


def make_params(key, cardinalities, numerical_size):
    # embedding dim rule (embedding_vectors_preparation.get_embedding_vector_dimension)
    emb_dims = [min(50, (c + 1) // 2) for c in cardinalities]
    n = len(cardinalities)
    keys = jax.random.split(key, n + 6)

    emb_tables = [
        jax.random.normal(keys[i], (cardinalities[i], emb_dims[i]), jnp.float32)
        for i in range(n)
    ]
    input_size = sum(emb_dims) + numerical_size

    w1, b1 = _linear_init(keys[n + 0], input_size, 64)
    w2, b2 = _linear_init(keys[n + 1], 64, 16)
    w3, b3 = _linear_init(keys[n + 2], 16, 1)

    def bn_random(k, m):
        # Non-trivial eval-mode BN stats so the folding is actually exercised.
        kg, kb_, km, kv = jax.random.split(k, 4)
        gamma = jax.random.uniform(kg, (m,), jnp.float32, 0.5, 1.5)
        beta = jax.random.uniform(kb_, (m,), jnp.float32, -0.5, 0.5)
        rmean = 0.1 * jax.random.normal(km, (m,), jnp.float32)
        rvar = jax.random.uniform(kv, (m,), jnp.float32, 0.5, 1.5)
        return gamma, beta, rmean, rvar

    return {
        "emb_tables": emb_tables,
        "w1": w1, "b1": b1,
        "w2": w2, "b2": b2,
        "w3": w3, "b3": b3,
        "bn1": bn_random(keys[n + 3], numerical_size),
        "bn2": bn_random(keys[n + 4], 64),
        "bn3": bn_random(keys[n + 5], 16),
    }, emb_dims


def _reference_forward(params, numerical, categorical):
    """Pure-JAX reference mirroring the PyTorch eval path (no folding)."""
    def bn_eval(x, g, b, rm, rv):
        return (x - rm) / jnp.sqrt(rv + EPS) * g + b

    n_cat = categorical.shape[1]
    emb = jnp.concatenate(
        [params["emb_tables"][i][categorical[:, i]] for i in range(n_cat)], axis=1)
    num_bn = bn_eval(numerical, *params["bn1"])
    x = jnp.concatenate([emb, num_bn], axis=1)
    h = jnp.maximum(x @ params["w1"] + params["b1"], 0.0)
    h = bn_eval(h, *params["bn2"])
    h = jnp.maximum(h @ params["w2"] + params["b2"], 0.0)
    h = bn_eval(h, *params["bn3"])
    return h @ params["w3"] + params["b3"]


if __name__ == "__main__":
    key = jax.random.PRNGKey(0)
    k_param, k_num, k_cat = jax.random.split(key, 3)

    # Synthetic problem: 3 categorical columns, 5 numerical features.
    cardinalities = [7, 12, 24]
    numerical_size = 5
    params, emb_dims = make_params(k_param, cardinalities, numerical_size)

    def make_batch(b, knum, kcat):
        numerical = jax.random.normal(knum, (b, numerical_size), jnp.float32)
        categorical = jnp.stack(
            [jax.random.randint(jax.random.fold_in(kcat, i), (b,), 0, c)
             for i, c in enumerate(cardinalities)],
            axis=1,
        ).astype(jnp.int32)
        return numerical, categorical

    # 1) Small ragged batch, f32 numerical stream: tight match vs. reference.
    numerical, categorical = make_batch(37, k_num, k_cat)
    ref = _reference_forward(params, numerical, categorical)
    out = jax.block_until_ready(
        zero_classifier_forward(params, numerical, categorical,
                                num_dtype=jnp.float32))
    assert out.shape == (37, 1), out.shape
    assert jnp.allclose(out, ref, atol=1e-4, rtol=1e-4)

    # 2) Multi-tile path (block_b=128 -> padded batch 384, 3 parallel tiles) with the
    #    default bf16 numerical stream; compare against a reference fed the same
    #    bf16-rounded numerical input so the tolerance can stay tight.
    k_num2, k_cat2 = jax.random.fold_in(k_num, 1), jax.random.fold_in(k_cat, 1)
    numerical2, categorical2 = make_batch(300, k_num2, k_cat2)
    num2_bf = numerical2.astype(jnp.bfloat16).astype(jnp.float32)
    ref2 = _reference_forward(params, num2_bf, categorical2)
    out2 = jax.block_until_ready(
        zero_classifier_forward(params, numerical2, categorical2, block_b=128))
    assert out2.shape == (300, 1), out2.shape
    assert jnp.allclose(out2, ref2, atol=1e-4, rtol=1e-4)

    print("KERNEL_OK")
</pallas_src>

<mosaic_0001>
module attributes {stable_mosaic.version = 11 : i64} {
  func.func @kernel(%arg0: i32, %arg1: memref<3x128xi32, #tpu.memory_space<vmem>>, %arg2: memref<5x128xf32, #tpu.memory_space<vmem>>, %arg3: memref<64x48xf32, #tpu.memory_space<vmem>>, %arg4: memref<64x5xf32, #tpu.memory_space<vmem>>, %arg5: memref<16x64xf32, #tpu.memory_space<vmem>>, %arg6: memref<16x1xf32, #tpu.memory_space<vmem>>, %arg7: memref<1x16xf32, #tpu.memory_space<vmem>>, %arg8: memref<1x1xf32, #tpu.memory_space<vmem>>, %arg9: memref<1x128xf32, #tpu.memory_space<vmem>>) attributes {dimension_semantics = [#tpu.dimension_semantics<parallel>], iteration_bounds = array<i64: 1>, scalar_prefetch = 0 : i64, scratch_operands = 0 : i64, tpu.core_type = #tpu.core_type<tc>, window_params = [{transform_indices = @transform_0, window_bounds = array<i64: 3, 128>}, {transform_indices = @transform_1, window_bounds = array<i64: 5, 128>}, {pipeline_mode = #tpu.pipeline_mode<synchronous>, transform_indices = @transform_2, window_bounds = array<i64: 64, 48>}, {pipeline_mode = #tpu.pipeline_mode<synchronous>, transform_indices = @transform_3, window_bounds = array<i64: 64, 5>}, {pipeline_mode = #tpu.pipeline_mode<synchronous>, transform_indices = @transform_4, window_bounds = array<i64: 16, 64>}, {pipeline_mode = #tpu.pipeline_mode<synchronous>, transform_indices = @transform_5, window_bounds = array<i64: 16, 1>}, {pipeline_mode = #tpu.pipeline_mode<synchronous>, transform_indices = @transform_6, window_bounds = array<i64: 1, 16>}, {pipeline_mode = #tpu.pipeline_mode<synchronous>, transform_indices = @transform_7, window_bounds = array<i64: 1, 1>}, {transform_indices = @transform_8, window_bounds = array<i64: 1, 128>}]} {
    %c0 = arith.constant 0 : index
    %c0_0 = arith.constant 0 : index
    %0 = vector.load %arg1[%c0, %c0_0] : memref<3x128xi32, #tpu.memory_space<vmem>>, vector<3x128xi32>
    %1 = tpu.iota {dimensions = array<i32: 0>} : vector<48x128xi32>
    %c43_i32 = arith.constant 43 : i32
    %2 = vector.broadcast %c43_i32 : i32 to vector<48x128xi32>
    %3 = arith.cmpi eq, %1, %2 : vector<48x128xi32>
    %4 = arith.extui %3 : vector<48x128xi1> to vector<48x128xi32>
    %5 = arith.sitofp %4 : vector<48x128xi32> to vector<48x128xf32>
    %6 = vector.extract_strided_slice %0 {offsets = [0, 0], sizes = [1, 128], strides = [1, 1]} : vector<3x128xi32> to vector<1x128xi32>
    %7 = vector.broadcast %6 : vector<1x128xi32> to vector<48x128xi32>
    %8 = arith.cmpi eq, %7, %1 : vector<48x128xi32>
    %9 = arith.extui %8 : vector<48x128xi1> to vector<48x128xi32>
    %10 = arith.sitofp %9 : vector<48x128xi32> to vector<48x128xf32>
    %11 = arith.addf %5, %10 : vector<48x128xf32>
    %12 = vector.extract_strided_slice %0 {offsets = [1, 0], sizes = [1, 128], strides = [1, 1]} : vector<3x128xi32> to vector<1x128xi32>
    %13 = vector.broadcast %12 : vector<1x128xi32> to vector<48x128xi32>
    %14 = arith.cmpi eq, %13, %1 : vector<48x128xi32>
    %15 = arith.extui %14 : vector<48x128xi1> to vector<48x128xi32>
    %16 = arith.sitofp %15 : vector<48x128xi32> to vector<48x128xf32>
    %17 = arith.addf %11, %16 : vector<48x128xf32>
    %18 = vector.extract_strided_slice %0 {offsets = [2, 0], sizes = [1, 128], strides = [1, 1]} : vector<3x128xi32> to vector<1x128xi32>
    %19 = vector.broadcast %18 : vector<1x128xi32> to vector<48x128xi32>
    %20 = arith.cmpi eq, %19, %1 : vector<48x128xi32>
    %21 = arith.extui %20 : vector<48x128xi1> to vector<48x128xi32>
    %22 = arith.sitofp %21 : vector<48x128xi32> to vector<48x128xf32>
    %23 = arith.addf %17, %22 : vector<48x128xf32>
    %c0_1 = arith.constant 0 : index
    %c0_2 = arith.constant 0 : index
    %24 = vector.load %arg3[%c0_1, %c0_2] : memref<64x48xf32, #tpu.memory_space<vmem>>, vector<64x48xf32>
    %cst = arith.constant dense<0.000000e+00> : vector<64x128xf32>
    %25 = tpu.matmul %24, %23, %cst {dimension_numbers = #tpu.dot_dimension_numbers<[1], [0], [0], [1], [0, 0, 1, 1], [], []>} : vector<64x48xf32>, vector<48x128xf32>, vector<64x128xf32> -> vector<64x128xf32>
    %c0_3 = arith.constant 0 : index
    %c0_4 = arith.constant 0 : index
    %26 = vector.load %arg4[%c0_3, %c0_4] : memref<64x5xf32, #tpu.memory_space<vmem>>, vector<64x5xf32>
    %c0_5 = arith.constant 0 : index
    %c0_6 = arith.constant 0 : index
    %27 = vector.load %arg2[%c0_5, %c0_6] : memref<5x128xf32, #tpu.memory_space<vmem>>, vector<5x128xf32>
    %cst_7 = arith.constant dense<0.000000e+00> : vector<64x128xf32>
    %28 = tpu.matmul %26, %27, %cst_7 {dimension_numbers = #tpu.dot_dimension_numbers<[1], [0], [0], [1], [0, 0, 1, 1], [], []>} : vector<64x5xf32>, vector<5x128xf32>, vector<64x128xf32> -> vector<64x128xf32>
    %29 = arith.addf %25, %28 : vector<64x128xf32>
    %cst_8 = arith.constant 0.000000e+00 : f32
    %30 = vector.broadcast %cst_8 : f32 to vector<64x128xf32>
    %31 = arith.maximumf %29, %30 : vector<64x128xf32>
    %c0_9 = arith.constant 0 : index
    %c0_10 = arith.constant 0 : index
    %32 = vector.load %arg5[%c0_9, %c0_10] : memref<16x64xf32, #tpu.memory_space<vmem>>, vector<16x64xf32>
    %cst_11 = arith.constant dense<0.000000e+00> : vector<16x128xf32>
    %33 = tpu.matmul %32, %31, %cst_11 {dimension_numbers = #tpu.dot_dimension_numbers<[1], [0], [0], [1], [0, 0, 1, 1], [], []>} : vector<16x64xf32>, vector<64x128xf32>, vector<16x128xf32> -> vector<16x128xf32>
    %c0_12 = arith.constant 0 : index
    %c0_13 = arith.constant 0 : index
    %34 = vector.load %arg6[%c0_12, %c0_13] : memref<16x1xf32, #tpu.memory_space<vmem>>, vector<16x1xf32>
    %35 = vector.broadcast %34 : vector<16x1xf32> to vector<16x128xf32>
    %36 = arith.addf %33, %35 : vector<16x128xf32>
    %cst_14 = arith.constant 0.000000e+00 : f32
    %37 = vector.broadcast %cst_14 : f32 to vector<16x128xf32>
    %38 = arith.maximumf %36, %37 : vector<16x128xf32>
    %c0_15 = arith.constant 0 : index
    %c0_16 = arith.constant 0 : index
    %39 = vector.load %arg7[%c0_15, %c0_16] : memref<1x16xf32, #tpu.memory_space<vmem>>, vector<1x16xf32>
    %cst_17 = arith.constant dense<0.000000e+00> : vector<1x128xf32>
    %40 = tpu.matmul %39, %38, %cst_17 {dimension_numbers = #tpu.dot_dimension_numbers<[1], [0], [0], [1], [0, 0, 1, 1], [], []>} : vector<1x16xf32>, vector<16x128xf32>, vector<1x128xf32> -> vector<1x128xf32>
    %c0_18 = arith.constant 0 : index
    %c0_19 = arith.constant 0 : index
    %41 = vector.load %arg8[%c0_18, %c0_19] : memref<1x1xf32, #tpu.memory_space<vmem>>, vector<1x1xf32>
    %42 = vector.broadcast %41 : vector<1x1xf32> to vector<1x128xf32>
    %43 = arith.addf %40, %42 : vector<1x128xf32>
    %c0_20 = arith.constant 0 : index
    %c0_21 = arith.constant 0 : index
    %44 = vector.load %arg9[%c0_20, %c0_21] : memref<1x128xf32, #tpu.memory_space<vmem>>, vector<1x128xf32>
    tpu.vector_store %arg9[%c0_20, %c0_21], %43 {strides = array<i32>} : memref<1x128xf32, #tpu.memory_space<vmem>>, vector<1x128xf32>,
    return
  }
  func.func @transform_0(%arg0: i32) -> (i32, i32) {
    %c0_i32 = arith.constant 0 : i32
    %c0_i32_0 = arith.constant 0 : i32
    return %c0_i32, %arg0 : i32, i32
  }
  func.func @transform_1(%arg0: i32) -> (i32, i32) {
    %c0_i32 = arith.constant 0 : i32
    %c0_i32_0 = arith.constant 0 : i32
    return %c0_i32, %arg0 : i32, i32
  }
  func.func @transform_2(%arg0: i32) -> (i32, i32) {
    %c0_i32 = arith.constant 0 : i32
    %c0_i32_0 = arith.constant 0 : i32
    %c0_i32_1 = arith.constant 0 : i32
    return %c0_i32, %c0_i32_0 : i32, i32
  }
  func.func @transform_3(%arg0: i32) -> (i32, i32) {
    %c0_i32 = arith.constant 0 : i32
    %c0_i32_0 = arith.constant 0 : i32
    %c0_i32_1 = arith.constant 0 : i32
    return %c0_i32, %c0_i32_0 : i32, i32
  }
  func.func @transform_4(%arg0: i32) -> (i32, i32) {
    %c0_i32 = arith.constant 0 : i32
    %c0_i32_0 = arith.constant 0 : i32
    %c0_i32_1 = arith.constant 0 : i32
    return %c0_i32, %c0_i32_0 : i32, i32
  }
  func.func @transform_5(%arg0: i32) -> (i32, i32) {
    %c0_i32 = arith.constant 0 : i32
    %c0_i32_0 = arith.constant 0 : i32
    %c0_i32_1 = arith.constant 0 : i32
    return %c0_i32, %c0_i32_0 : i32, i32
  }
  func.func @transform_6(%arg0: i32) -> (i32, i32) {
    %c0_i32 = arith.constant 0 : i32
    %c0_i32_0 = arith.constant 0 : i32
    %c0_i32_1 = arith.constant 0 : i32
    return %c0_i32, %c0_i32_0 : i32, i32
  }
  func.func @transform_7(%arg0: i32) -> (i32, i32) {
    %c0_i32 = arith.constant 0 : i32
    %c0_i32_0 = arith.constant 0 : i32
    %c0_i32_1 = arith.constant 0 : i32
    return %c0_i32, %c0_i32_0 : i32, i32
  }
  func.func @transform_8(%arg0: i32) -> (i32, i32) {
    %c0_i32 = arith.constant 0 : i32
    %c0_i32_0 = arith.constant 0 : i32
    return %c0_i32, %arg0 : i32, i32
  }
}

</mosaic_0001>

<bundles_post_ra>
// kernel: tpu_custom_call.1
= control target key start
LH: loop header
LB: loop body
LE: loop exit
PB: predicated region body
PF: predicated region fallthrough
CT: control target
= control target key end

     0   :  { %s993_s0 = inlined_call_operand.vmem [shape: s32[3,128], index: 0, kind: input, shape index: {}]   ;;  %s994_s1 = inlined_call_operand.vmem [shape: f32[5,128], index: 1, kind: input, shape index: {}]   ;;  %s995_s2 = inlined_call_operand.vmem [shape: f32[64,48], index: 2, kind: input, shape index: {}]   ;;  %s996_s3 = inlined_call_operand.vmem [shape: f32[64,5], index: 3, kind: input, shape index: {}]   ;;  %s997_s4 = inlined_call_operand.vmem [shape: f32[16,64], index: 4, kind: input, shape index: {}]   ;;  %s998_s5 = inlined_call_operand.vmem [shape: f32[16,1], index: 5, kind: input, shape index: {}]   ;;  %s999_s6 = inlined_call_operand.vmem [shape: f32[1,16], index: 6, kind: input, shape index: {}]   ;;  %s1000_s7 = inlined_call_operand.<no memory space> [shape: f32[1,1], index: 7, kind: input, shape index: {}]   ;;  %s1001_s8 = inlined_call_operand.hbm [shape: f32[1,128], index: 8, kind: output, shape index: {}]  }
   0x1   :  { %v13_v0 = vstv %s1000_s7 }
   0x2   :  { %14 = vst [vmem:[#allocation2] sm:$0x1] %v13_v0 }
   0x3   :  { %v33_v1 = vlaneseq  ;;  %v158_v2 = vld [vmem:[%s994_s1] sm:$0x1f]  ;;  %vm184_vm0 = vcmask 1044480   ;;  %vm159_vm1 = vcmask 39936   ;;  %v151_v4 = vld [vmem:[%s996_s3 + $0x8] sm:$0xff]  ;;  %vm293_vm2 = vcmask 392192  }
   0x4   :  { %704 = vmatprep.subr.msk.mxu0 %vm184_vm0, %v158_v2  ;;  %v150_v3 = vld [vmem:[%s996_s3] sm:$0xff]  ;;  %v152_v7 = vld [vmem:[%s996_s3 + $0x10] sm:$0xff]  ;;  %v153_v13 = vld [vmem:[%s996_s3 + $0x18] sm:$0xff]  ;;  %v796_v20 = vmov 0.0  }
   0x5   :  { %v142_v5 = vld [vmem:[%s995_s2] sm:$0xff]  ;;  %v860_v6 = vshrl.u32 %v33_v1, 7  ;;  %705 = vmatpush3.msk.msra.mxu0 %vm184_vm0, %v158_v2  ;;  %706 = vmatprep.mubr.msk.f32.mxu0 %vm159_vm1, %v150_v3 }
   0x6   :  { %v32_v8 = vld [vmem:[%s993_s0] sm:$0x7]  ;;  %707 = vmatmul.mubr.msk.f32.vlgmr.msra.gmra.mxu0 %vm159_vm1, %v151_v4  ;;  %730 = vmatprep.mubr.msk.f32.mxu1 %vm293_vm2, %v142_v5 }
   0x7   :  { %v39_v9 = vadd.s32 40, %v860_v6  ;;  %v60_v10 = vsub.s32 0, %v860_v6  ;;  %v88_v11 = vsub.s32 1, %v860_v6  ;;  %v116_v12 = vsub.s32 2, %v860_v6  ;;  %709 = vmatprep.mubr.msk.f32.mxu0 %vm159_vm1, %v152_v7  ;;  %v154_v16 = vld [vmem:[%s996_s3 + $0x20] sm:$0xff] }
   0x8   :  { %v38_v14 = vadd.s32 32, %v860_v6  ;;  %v37_v15 = vadd.s32 24, %v860_v6  ;;  %v36_v22 = vadd.s32 16, %v860_v6  ;;  %v35_v23 = vadd.s32 8, %v860_v6 }
   0x9   :  { %vm45_vm3 = vcmp.eq.s32.totalorder %v39_v9, 43  ;;  %v61_v17 = vrot.slane %v32_v8, %v60_v10  ;;  %v886_v18 = vrot.slane %v32_v8, %v88_v11  ;;  %v888_v19 = vrot.slane %v32_v8, %v116_v12 }
   0xa   :  { %v629_v21 = vsel %vm45_vm3, 1.0, %v796_v20  ;;  %710 = vmatmul.mubr.msk.f32.gmra.mxu0 %vm159_vm1, %v153_v13 }
   0xb   :  { %15 = vsyncpa [#allocation4], 0  ;;  %vm67_vm4 = vcmp.eq.s32.totalorder %v61_v17, %v39_v9  ;;  %vm95_vm5 = vcmp.eq.s32.totalorder %v886_v18, %v39_v9  ;;  %vm123_vm6 = vcmp.eq.s32.totalorder %v888_v19, %v39_v9  ;;  %vm66_vm7 = vcmp.eq.s32.totalorder %v61_v17, %v38_v14  ;;  %712 = vmatprep.mubr.msk.f32.mxu0 %vm159_vm1, %v154_v16  ;;  %v155_v24 = vld [vmem:[%s996_s3 + $0x28] sm:$0xff]  ;;  %v156_v29 = vld [vmem:[%s996_s3 + $0x30] sm:$0xff]  ;;  %s799_s21 = smov [#allocation3]  }
   0xc   :  { %v635_v25 = vsel %vm67_vm4, 1.0, %v796_v20  ;;  %v641_v26 = vsel %vm95_vm5, 1.0, %v796_v20  ;;  %v647_v27 = vsel %vm123_vm6, 1.0, %v796_v20  ;;  %v634_v28 = vsel %vm66_vm7, 1.0, %v796_v20  ;;  %v157_v37 = vld [vmem:[%s996_s3 + $0x38] sm:$0xff]  ;;  %v143_v58 = vld [vmem:[%s995_s2 + $0x8] sm:$0xff] }
   0xd   :  { %v85_v30 = vadd.f32 %v635_v25, %v629_v21  ;;  %vm94_vm8 = vcmp.eq.s32.totalorder %v886_v18, %v38_v14  ;;  %vm122_vm9 = vcmp.eq.s32.totalorder %v888_v19, %v38_v14  ;;  %vm65_vm10 = vcmp.eq.s32.totalorder %v61_v17, %v37_v15  ;;  %v144_v59 = vld [vmem:[%s995_s2 + $0x10] sm:$0xff]  ;;  %v145_v60 = vld [vmem:[%s995_s2 + $0x18] sm:$0xff]  ;;  %v146_v61 = vld [vmem:[%s995_s2 + $0x20] sm:$0xff]  ;;  %s621_s22 = sshll.u32 %s799_s21, 4  ;;  %s622_s22 = int_to_ptr.vmem [resolvable:$true] %s621_s22 }
   0xe   :  { %v640_v31 = vsel %vm94_vm8, 1.0, %v796_v20  ;;  %v646_v32 = vsel %vm122_vm9, 1.0, %v796_v20  ;;  %v633_v33 = vsel %vm65_vm10, 1.0, %v796_v20  ;;  %vm93_vm11 = vcmp.eq.s32.totalorder %v886_v18, %v37_v15  ;;  %713 = vmatmul.mubr.msk.f32.gmra.mxu0 %vm159_vm1, %v155_v24  ;;  %v147_v62 = vld [vmem:[%s995_s2 + $0x28] sm:$0xff]  ;;  %v148_v63 = vld [vmem:[%s995_s2 + $0x30] sm:$0xff]  ;;  %v149_v0 = vld [vmem:[%s995_s2 + $0x38] sm:$0xff]  ;;  %p779_p1 = scmp.lt.s32.totalorder %s622_s22, %s622_s22 }
   0xf   :  { %v113_v34 = vadd.f32 %v641_v26, %v85_v30  ;;  %v112_v35 = vadd.f32 %v640_v31, %v634_v28  ;;  %v639_v36 = vsel %vm93_vm11, 1.0, %v796_v20  ;;  %vm121_vm12 = vcmp.eq.s32.totalorder %v888_v19, %v37_v15  ;;  %715 = vmatprep.mubr.msk.f32.mxu0 %vm159_vm1, %v156_v29  ;;  %v431_v1 = vld [vmem:[%s997_s4] sm:$0xff]  ;;  %v434_v2 = vld [vmem:[%s998_s5 + $0x8] sm:$0xff]  ;;  %s774_s23 = scalar_lea.vmem %s622_s22, 16  ;;  %s778_s24 = scalar_lea.vmem %s622_s22, 32 }
  0x10   :  { %v111_v38 = vadd.f32 %v639_v36, %v633_v33  ;;  %v645_v39 = vsel %vm121_vm12, 1.0, %v796_v20  ;;  %vm64_vm13 = vcmp.eq.s32.totalorder %v61_v17, %v36_v22  ;;  %vm92_vm14 = vcmp.eq.s32.totalorder %v886_v18, %v36_v22  ;;  %v433_v4 = vld [vmem:[%s998_s5] sm:$0xff]  ;;  %p775_p0 = scmp.ne.s32.totalorder %s622_s22, %s774_s23  ;;  %p780_p2 = scmp.lt.s32.totalorder %s778_s24, %s774_s23 }
  0x11   :  { %v141_v40 = vadd.f32 %v647_v27, %v113_v34  ;;  %v140_v41 = vadd.f32 %v646_v32, %v112_v35  ;;  %v632_v42 = vsel %vm64_vm13, 1.0, %v796_v20  ;;  %v638_v43 = vsel %vm92_vm14, 1.0, %v796_v20 }
  0x12   :  { %v139_v44 = vadd.f32 %v645_v39, %v111_v38  ;;  %v110_v45 = vadd.f32 %v638_v43, %v632_v42  ;;  %vm120_vm15 = vcmp.eq.s32.totalorder %v888_v19, %v36_v22  ;;  %vm63_vm0 = vcmp.eq.s32.totalorder %v61_v17, %v35_v23  ;;  %716 = vmatmul.mubr.msk.f32.gmra.mxu0 %vm159_vm1, %v157_v37  ;;  %p781_p3 = por %p780_p2, %p779_p1 }
  0x13   :  { %718 = vmatprep.subr.mxu1 %v141_v40  ;;  %v644_v46 = vsel %vm120_vm15, 1.0, %v796_v20  ;;  %v631_v47 = vsel %vm63_vm0, 1.0, %v796_v20  ;;  %vm91_vm3 = vcmp.eq.s32.totalorder %v886_v18, %v35_v23  ;;  %vm119_vm4 = vcmp.eq.s32.totalorder %v888_v19, %v35_v23 }
  0x14   :  { %719 = vmatpush3.msra.mxu1 %v141_v40  ;;  %v138_v48 = vadd.f32 %v644_v46, %v110_v45  ;;  %v637_v49 = vsel %vm91_vm3, 1.0, %v796_v20  ;;  %v643_v50 = vsel %vm119_vm4, 1.0, %v796_v20  ;;  %vm62_vm5 = vcmp.eq.s32.totalorder %v61_v17, %v860_v6  ;;  %v432_v40 = vld [vmem:[%s997_s4 + $0x8] sm:$0xff]  ;;  %p782_p4 = pnand %p781_p3, %p775_p0 }
  0x15   :  { %720 = vmatprep.subr.mxu1 %v140_v41  ;;  %v109_v51 = vadd.f32 %v637_v49, %v631_v47  ;;  %v630_v52 = vsel %vm62_vm5, 1.0, %v796_v20  ;;  %vm90_vm1 = vcmp.eq.s32.totalorder %v886_v18, %v860_v6  ;;  %vm118_vm6 = vcmp.eq.s32.totalorder %v888_v19, %v860_v6 }
  0x16   :  { %721 = vmatpush3.msra.mxu1 %v140_v41  ;;  %v636_v53 = vsel %vm90_vm1, 1.0, %v796_v20  ;;  %v642_v54 = vsel %vm118_vm6, 1.0, %v796_v20  ;;  %vm445_vm7 = vcmask 523264   ;;  %v797_v3 = vmov 0   ;;  %v530_v41 = vld [vmem:[#allocation2] sm:$0x1] }
  0x17   :  { %722 = vmatprep.subr.mxu1 %v139_v44  ;;  %v137_v55 = vadd.f32 %v643_v50, %v109_v51  ;;  %v108_v56 = vadd.f32 %v636_v53, %v630_v52  ;;  %758 = vmatprep.mubr.msk.f32.mxu0 %vm445_vm7, %v431_v1  ;;  %v529_v50 = vld [vmem:[%s999_s6] sm:$0x1]  ;;  %vm540_vm8 = vcmask 130048  }
  0x18   :  { %723 = vmatpush3.msra.mxu1 %v139_v44  ;;  %772 = vset.pattern.permute.xlu0 %v797_v3 }
  0x19   :  { %724 = vmatprep.subr.mxu1 %v138_v48  ;;  %v136_v57 = vadd.f32 %v642_v54, %v108_v56  ;;  %773 = vset.pattern.permute.xlu1 %v797_v3 }
  0x1a   :  { %725 = vmatpush3.msra.mxu1 %v138_v48  ;;  %442 = vperm.xlu0 %772, %v434_v2  }
  0x1b   :  { %726 = vmatprep.subr.mxu1 %v137_v55  ;;  %533 = vperm.xlu1 %773, %v530_v41  }
  0x1c   :  { %727 = vmatpush3.msra.mxu1 %v137_v55 }
  0x1d   :  { %728 = vmatprep.subr.mxu1 %v136_v57 }
  0x1e   :  { %729 = vmatpush3.msra.mxu1 %v136_v57  ;;  %437 = vperm.xlu0 %772, %v433_v4  }
  0x1f   :  { %731 = vmatmul.mubr.msk.f32.vlgmr.msra.gmra.mxu1 %vm293_vm2, %v143_v58 }
  0x20   :  { %733 = vmatprep.mubr.msk.f32.mxu1 %vm293_vm2, %v144_v59 }
  0x23   :  { %734 = vmatmul.mubr.msk.f32.gmra.mxu1 %vm293_vm2, %v145_v60 }
  0x24   :  { %736 = vmatprep.mubr.msk.f32.mxu1 %vm293_vm2, %v146_v61 }
  0x27   :  { %737 = vmatmul.mubr.msk.f32.gmra.mxu1 %vm293_vm2, %v147_v62 }
  0x28   :  { %739 = vmatprep.mubr.msk.f32.mxu1 %vm293_vm2, %v148_v63 }
  0x2b   :  { %740 = vmatmul.mubr.msk.f32.gmra.mxu1 %vm293_vm2, %v149_v0  ;;  %vm798_vm2 = vmmov 0  }
  0x95   :  { %v443_v42 = vpop.permute.xlu0 %442 }
  0x96   :  { %v534_v51 = vpop.permute.xlu1 %533 }
  0x97   :  { %v539_v52 = vrot.slane %v534_v51, %v60_v10 }
  0x99   :  { %v438_v45 = vpop.permute.xlu0 %437 }
  0xc6   :  { %v708_v5 = vpop.f32.mrf.mxu0 }
  0xc8   :  { %v254_v7 = vpop.f32.mrf.mxu0 }
  0xca   :  { %v711_v8 = vpop.f32.mrf.mxu0 }
  0xcc   :  { %v264_v9 = vpop.f32.mrf.mxu0 }
  0xce   :  { %v714_v13 = vpop.f32.mrf.mxu0 }
  0xd0   :  { %v274_v16 = vpop.f32.mrf.mxu0 }
  0xd2   :  { %v717_v18 = vpop.f32.mrf.mxu0 }
  0xd4   :  { %v284_v23 = vpop.f32.mrf.mxu0 }
  0xdf   :  { %v732_v11 = vpop.f32.mrf.mxu1 }
  0xe0   :  { %v390_v34 = vadd.f32 %v732_v11, %v708_v5 }
  0xe1   :  { %v384_v12 = vpop.f32.mrf.mxu1 }
  0xe2   :  { %v385_v36 = vadd.f32 %v384_v12, %v254_v7  ;;  %v424_v38 = vmax.f32 %v390_v34, 0.0 }
  0xe3   :  { %v735_v14 = vpop.f32.mrf.mxu1 }
  0xe4   :  { %v400_v30 = vadd.f32 %v735_v14, %v711_v8  ;;  %v423_v39 = vmax.f32 %v385_v36, 0.0 }
  0xe5   :  { %v394_v15 = vpop.f32.mrf.mxu1 }
  0xe6   :  { %v395_v32 = vadd.f32 %v394_v15, %v264_v9  ;;  %v426_v35 = vmax.f32 %v400_v30, 0.0 }
  0xe7   :  { %v738_v17 = vpop.f32.mrf.mxu1 }
  0xe8   :  { %v410_v25 = vadd.f32 %v738_v17, %v714_v13  ;;  %v425_v37 = vmax.f32 %v395_v32, 0.0 }
  0xe9   :  { %v404_v19 = vpop.f32.mrf.mxu1 }
  0xea   :  { %v405_v28 = vadd.f32 %v404_v19, %v274_v16  ;;  %v428_v31 = vmax.f32 %v410_v25, 0.0 }
  0xeb   :  { %v741_v21 = vpop.f32.mrf.mxu1 }
  0xec   :  { %v420_v22 = vadd.f32 %v741_v21, %v717_v18  ;;  %v427_v33 = vmax.f32 %v405_v28, 0.0 }
  0xed   :  { %v414_v24 = vpop.f32.mrf.mxu1 }
  0xee   :  { %v430_v26 = vmax.f32 %v420_v22, 0.0  ;;  %v415_v27 = vadd.f32 %v414_v24, %v284_v23 }
  0xf0   :  { %v429_v29 = vmax.f32 %v415_v27, 0.0  ;;  %742 = vmatprep.subr.mxu0 %v430_v26 }
  0xf1   :  { %743 = vmatpush3.msra.mxu0 %v430_v26 }
  0xf2   :  { %744 = vmatprep.subr.mxu0 %v429_v29 }
  0xf3   :  { %745 = vmatpush3.msra.mxu0 %v429_v29 }
  0xf4   :  { %746 = vmatprep.subr.mxu0 %v428_v31 }
  0xf5   :  { %747 = vmatpush3.msra.mxu0 %v428_v31 }
  0xf6   :  { %748 = vmatprep.subr.mxu0 %v427_v33 }
  0xf7   :  { %749 = vmatpush3.msra.mxu0 %v427_v33 }
  0xf8   :  { %750 = vmatprep.subr.mxu0 %v426_v35 }
  0xf9   :  { %751 = vmatpush3.msra.mxu0 %v426_v35 }
  0xfa   :  { %752 = vmatprep.subr.mxu0 %v425_v37 }
  0xfb   :  { %753 = vmatpush3.msra.mxu0 %v425_v37 }
  0xfc   :  { %754 = vmatprep.subr.mxu0 %v424_v38 }
  0xfd   :  { %755 = vmatpush3.msra.mxu0 %v424_v38 }
  0xfe   :  { %756 = vmatprep.subr.mxu0 %v423_v39 }
  0xff   :  { %757 = vmatpush3.msra.mxu0 %v423_v39 }
 0x100   :  { %759 = vmatmul.mubr.msk.f32.vlgmr.msra.gmra.mxu0 %vm445_vm7, %v432_v40  ;;  %761 = vmatprep.subr.mxu0 %v796_v20 }
 0x101   :  { %765 = vmatprep.mubr.msk.f32.mxu0 %vm798_vm2, %v796_v20 }
 0x1c0   :  { %v760_v43 = vpop.f32.mrf.mxu0 }
 0x1c1   :  { %v524_v44 = vadd.f32 %v760_v43, %v443_v42 }
 0x1c2   :  { %v518_v46 = vpop.f32.mrf.mxu0 }
 0x1c3   :  { %v528_v47 = vmax.f32 %v524_v44, 0.0  ;;  %v519_v48 = vadd.f32 %v518_v46, %v438_v45 }
 0x1c5   :  { %v527_v49 = vmax.f32 %v519_v48, 0.0  ;;  %762 = vmatpush3.msra.mxu0 %v528_v47 }
 0x1c6   :  { %763 = vmatprep.subr.mxu0 %v796_v20 }
 0x1c7   :  { %764 = vmatpush3.msra.mxu0 %v527_v49 }
 0x1c8   :  { %766 = vmatmul.mubr.msk.f32.vlgmr.msra.gmra.mxu0 %vm540_vm8, %v529_v50 }
 0x288   :  { %v610_v53 = vpop.f32.mrf.mxu0 }
 0x289   :  { %v611_v54 = vadd.f32 %v610_v53, %v539_v52 }
 0x28a   :  { %v767_v55 = vpop.f32.mrf.mxu0 }
 0x28b   :  { %614 = vst [vmem:[#allocation3] sm:$0x1] %v611_v54 }
 0x28c   :  { %785 = shalt.err (!%p782_p4)
}
 0x28d   :  { %624 = dma.vmem_to_hbm [thread:$0]  %s622_s22, 16, %s1001_s8, [#allocation4]  }
 0x28e   :  { %794 = dma.done.wait [#allocation4], 16  }
 0x28f   :  { %795 = vsyncadd [#allocation4], 4294967280 }
 0x290   :  { %628 = vsyncpa [#allocation4], 1 }

</bundles_post_ra>
